<compile_context>
chip_gen: v6e
topology: v6e:2x2x1
jax: 0.10.0
libtpu: 0.0.40
codegen_flags: <defaults>
</compile_context>

<pallas_src>
import functools
import math

import jax
import jax.numpy as jnp
from jax.experimental import pallas as pl
from jax.experimental.pallas import tpu as pltpu


def _round_up(x, n):
    return ((x + n - 1) // n) * n


def critic_mlp_kernel(x_obs_ref, x_act_ref, w1o_ref, w1a_ref, b1_ref,
                      w2_ref, b2_ref, w3_ref, b3_ref, q_ref):
    """Fused 3-layer MLP for one row-tile.

    x_obs: [TM, obs_dim] f32, x_act: [TM, n_actions] f32   (cast to bf16 here)
    w1o:   [obs_dim, H]  bf16, w1a:   [n_actions, H] bf16
    b1,b2: [1, H] f32,  w2: [H, H] bf16,  w3: [1, H] bf16,  b3: [1] f32 (SMEM)
    q_ref: [1, TM] f32  (q values laid out lane-dense along the lane axis)
    """
    # In-kernel bf16 cast of the activation tiles: HBM only ever sees the f32
    # stream once; the cast is cheap VPU work fully hidden under the DMA.
    x_obs = x_obs_ref[...].astype(jnp.bfloat16)
    x_act = x_act_ref[...].astype(jnp.bfloat16)

    # fc1 (split matmul == concat(x_obs, x_act) @ w1) + bias + ReLU.
    # Keep the split (no HBM concat); at H=32 the extra MXU pushes are free
    # filler under the DMA-bound regime.
    h1 = (jnp.dot(x_obs, w1o_ref[...], preferred_element_type=jnp.float32)
          + jnp.dot(x_act, w1a_ref[...], preferred_element_type=jnp.float32)
          + b1_ref[...])
    h1 = jnp.maximum(h1, 0.0).astype(jnp.bfloat16)

    # fc2 + bias + ReLU (bias/ReLU in f32 on the VPU).
    h2 = jnp.dot(h1, w2_ref[...], preferred_element_type=jnp.float32) + b2_ref[...]
    h2 = jnp.maximum(h2, 0.0).astype(jnp.bfloat16)

    # fc3 as w3_row contracted with h2 on the hidden axis -> [1, TM].
    # Both operands contract on their last dim (same pattern as the q @ k^T
    # contraction in the TPU flash-attention kernel), which the MXU consumes
    # without a full [TM, H] h2 transpose, and the per-row scalars land
    # lane-dense on the output row (unmasked vst instead of [TM, 1] masked
    # stores).
    q = jax.lax.dot_general(
        w3_ref[...], h2,
        dimension_numbers=(((1,), (1,)), ((), ())),
        preferred_element_type=jnp.float32)
    q_ref[...] = q + b3_ref[0]


def pack_params(params, obs_dim):
    """One-time packing of the PyTorch-layout params into kernel layout.

    Runs OUTSIDE the per-call forward path so the slices / bf16 casts /
    reshapes are not re-executed as separate XLA ops every forward call.
    Weights are stored [fan_in, fan_out] so the kernel computes x @ W + b.
    """
    w1, b1, w2, b2, w3, b3 = params
    hidden = w1.shape[1]
    return (
        w1[:obs_dim].astype(jnp.bfloat16),           # w1_obs  [obs_dim, H]
        w1[obs_dim:].astype(jnp.bfloat16),           # w1_act  [n_act,  H]
        b1.reshape(1, hidden).astype(jnp.float32),   # b1      [1, H]
        w2.astype(jnp.bfloat16),                     # w2      [H, H]
        b2.reshape(1, hidden).astype(jnp.float32),   # b2      [1, H]
        w3.reshape(1, hidden).astype(jnp.bfloat16),  # w3_row  [1, H]
        b3.reshape(1).astype(jnp.float32),           # b3      [1] (SMEM)
    )


@functools.partial(jax.jit, static_argnames=("block_m",))
def itd3_critic_forward(inputs, actions, packed, *, block_m=8192):
    """inputs: [bs, n_agents, obs_dim], actions: [bs, n_agents, n_actions].

    `packed` is the output of pack_params (kernel-layout parameters).
    """
    w1_obs, w1_act, b1_r, w2_b, b2_r, w3_row, b3_s = packed
    bs, n_agents, obs_dim = inputs.shape
    n_act = actions.shape[-1]
    hidden = w1_obs.shape[1]
    m = bs * n_agents

    # Flatten to 2-D row-major.  Activations stay f32 (cast happens in-kernel).
    x_obs = inputs.reshape(m, obs_dim).astype(jnp.float32)
    x_act = actions.reshape(m, n_act).astype(jnp.float32)

    # Row-tile choice:
    #  * single tile (sublane-aligned to 8) for small m,
    #  * >= 2 tiles of 128-multiple width for large m so v7x can shard the
    #    "parallel" row axis across both TensorCores,
    #  * 128-multiple whenever num_tiles > 1 (output lane-divisibility rule).
    if m <= block_m:
        if m >= 4096:
            block_m = _round_up(-(-m // 2), 128)   # >=2 tiles, 128-aligned
        else:
            block_m = _round_up(m, 8)              # single tile
    else:
        block_m = max(128, _round_up(block_m, 128))
    num_tiles = pl.cdiv(m, block_m)
    assert num_tiles == 1 or block_m % 128 == 0, (block_m, num_tiles)

    # Advisory cost hint so XLA schedules the surrounding reshape/slice around
    # a correctly sized custom call.
    k1 = obs_dim + n_act
    flops = 2 * m * (k1 * hidden + hidden * hidden + hidden)
    weight_bytes = (k1 * hidden + hidden * hidden + hidden) * 2 + (2 * hidden + 1) * 4
    cost = pl.CostEstimate(
        flops=flops,
        transcendentals=0,
        bytes_accessed=m * k1 * 4 + m * 4 + weight_bytes,
    )

    q_out = pl.pallas_call(
        critic_mlp_kernel,
        out_shape=jax.ShapeDtypeStruct((1, num_tiles * block_m), jnp.float32),
        grid=(num_tiles,),
        in_specs=[
            pl.BlockSpec((block_m, obs_dim), lambda i: (i, 0)),   # x_obs tile
            pl.BlockSpec((block_m, n_act), lambda i: (i, 0)),     # x_act tile
            pl.BlockSpec((obs_dim, hidden), lambda i: (0, 0)),    # w1_obs (resident)
            pl.BlockSpec((n_act, hidden), lambda i: (0, 0)),      # w1_act (resident)
            pl.BlockSpec((1, hidden), lambda i: (0, 0)),          # b1
            pl.BlockSpec((hidden, hidden), lambda i: (0, 0)),     # w2
            pl.BlockSpec((1, hidden), lambda i: (0, 0)),          # b2
            pl.BlockSpec((1, hidden), lambda i: (0, 0)),          # w3 row
            pl.BlockSpec(memory_space=pltpu.MemorySpace.SMEM),    # b3 scalar
        ],
        out_specs=pl.BlockSpec((1, block_m), lambda i: (0, i)),
        compiler_params=pltpu.CompilerParams(
            dimension_semantics=("parallel",)),
        cost_estimate=cost,
    )(x_obs, x_act, w1_obs, w1_act, b1_r, w2_b, b2_r, w3_row, b3_s)

    # Ragged tail: out-of-range rows of the last tile are junk compute whose
    # lanes are sliced away here (each q lane depends only on its own row, so
    # valid outputs are never contaminated).  Restore [bs, n_agents, 1].
    q = q_out[0, :m].reshape(bs, n_agents, 1)
    return q


def init_linear(key, fan_in, fan_out):
    """Deterministic init matching nn.Linear's U(-1/sqrt(fan_in), +1/sqrt(fan_in)).

    Weights stored as [fan_in, fan_out] (transposed vs. PyTorch) so the kernel
    computes x @ W + b, numerically identical to PyTorch's x @ W.T + b.
    """
    kw, kb = jax.random.split(key)
    bound = 1.0 / math.sqrt(fan_in)
    w = jax.random.uniform(kw, (fan_in, fan_out), jnp.float32, -bound, bound)
    b = jax.random.uniform(kb, (1, fan_out), jnp.float32, -bound, bound)
    return w, b


def _reference(inputs, actions, params):
    """Pure-JAX f32 reference of the same forward pass."""
    w1, b1, w2, b2, w3, b3 = params
    x = jnp.concatenate([inputs, actions], axis=-1)
    bs, na, d = x.shape
    x = x.reshape(-1, d)
    h1 = jax.nn.relu(x @ w1 + b1)
    h2 = jax.nn.relu(h1 @ w2 + b2)
    return (h2 @ w3 + b3).reshape(bs, na, 1)


if __name__ == "__main__":
    # Small synthetic config consistent with the module:
    #   scheme['obs']['vshape'] = 19, obs_last_action=False, obs_agent_id=False
    #   n_actions = 5 -> input_shape = 19 + 5 = 24; hidden_dim = 32
    bs, n_agents, obs_dim, n_actions, hidden_dim = 2, 3, 19, 5, 32
    input_shape = obs_dim + n_actions

    key = jax.random.PRNGKey(0)
    k_in, k_act, k1, k2, k3, k_in2, k_act2 = jax.random.split(key, 7)

    w1, b1 = init_linear(k1, input_shape, hidden_dim)
    w2, b2 = init_linear(k2, hidden_dim, hidden_dim)
    w3, b3 = init_linear(k3, hidden_dim, 1)
    params = (w1, b1, w2, b2, w3, b3)
    packed = pack_params(params, obs_dim)   # one-time packing, outside forward

    # --- Test 1: tiny batch (single-tile path) ---
    inputs = jax.random.normal(k_in, (bs, n_agents, obs_dim), jnp.float32)
    actions = jax.random.normal(k_act, (bs, n_agents, n_actions), jnp.float32)
    q = jax.block_until_ready(itd3_critic_forward(inputs, actions, packed))
    q_ref = _reference(inputs, actions, params)
    assert q.shape == (bs, n_agents, 1)
    # bf16 MXU operands with f32 accumulation vs f32 reference -> loose tol.
    assert jnp.allclose(q, q_ref, atol=5e-2, rtol=5e-2), float(
        jnp.max(jnp.abs(q - q_ref)))

    # --- Test 2: multi-tile + ragged tail (m=320, block_m=128 -> 3 tiles) ---
    bs2, na2 = 64, 5
    inputs2 = jax.random.normal(k_in2, (bs2, na2, obs_dim), jnp.float32)
    actions2 = jax.random.normal(k_act2, (bs2, na2, n_actions), jnp.float32)
    q2 = jax.block_until_ready(
        itd3_critic_forward(inputs2, actions2, packed, block_m=128))
    q2_ref = _reference(inputs2, actions2, params)
    assert q2.shape == (bs2, na2, 1)
    assert jnp.allclose(q2, q2_ref, atol=5e-2, rtol=5e-2), float(
        jnp.max(jnp.abs(q2 - q2_ref)))

    print("KERNEL_OK")
</pallas_src>

<mosaic_0001>
module attributes {stable_mosaic.version = 11 : i64} {
  func.func @critic_mlp_kernel(%arg0: i32, %arg1: memref<8x19xf32, #tpu.memory_space<vmem>>, %arg2: memref<8x5xf32, #tpu.memory_space<vmem>>, %arg3: memref<19x32xbf16, #tpu.memory_space<vmem>>, %arg4: memref<5x32xbf16, #tpu.memory_space<vmem>>, %arg5: memref<1x32xf32, #tpu.memory_space<vmem>>, %arg6: memref<32x32xbf16, #tpu.memory_space<vmem>>, %arg7: memref<1x32xf32, #tpu.memory_space<vmem>>, %arg8: memref<1x32xbf16, #tpu.memory_space<vmem>>, %arg9: memref<1xf32, #tpu.memory_space<smem>>, %arg10: memref<1x8xf32, #tpu.memory_space<vmem>>) attributes {dimension_semantics = [#tpu.dimension_semantics<parallel>], iteration_bounds = array<i64: 1>, scalar_prefetch = 0 : i64, scratch_operands = 0 : i64, tpu.core_type = #tpu.core_type<tc>, window_params = [{transform_indices = @transform_0, window_bounds = array<i64: 8, 19>}, {transform_indices = @transform_1, window_bounds = array<i64: 8, 5>}, {pipeline_mode = #tpu.pipeline_mode<synchronous>, transform_indices = @transform_2, window_bounds = array<i64: 19, 32>}, {pipeline_mode = #tpu.pipeline_mode<synchronous>, transform_indices = @transform_3, window_bounds = array<i64: 5, 32>}, {pipeline_mode = #tpu.pipeline_mode<synchronous>, transform_indices = @transform_4, window_bounds = array<i64: 1, 32>}, {pipeline_mode = #tpu.pipeline_mode<synchronous>, transform_indices = @transform_5, window_bounds = array<i64: 32, 32>}, {pipeline_mode = #tpu.pipeline_mode<synchronous>, transform_indices = @transform_6, window_bounds = array<i64: 1, 32>}, {pipeline_mode = #tpu.pipeline_mode<synchronous>, transform_indices = @transform_7, window_bounds = array<i64: 1, 32>}, {transform_indices = @transform_8, window_bounds = array<i64: 1>}, {transform_indices = @transform_9, window_bounds = array<i64: 1, 8>}]} {
    %c0 = arith.constant 0 : index
    %c0_0 = arith.constant 0 : index
    %0 = vector.load %arg1[%c0, %c0_0] : memref<8x19xf32, #tpu.memory_space<vmem>>, vector<8x19xf32>
    %1 = arith.truncf %0 : vector<8x19xf32> to vector<8x19xbf16>
    %c0_1 = arith.constant 0 : index
    %c0_2 = arith.constant 0 : index
    %2 = vector.load %arg2[%c0_1, %c0_2] : memref<8x5xf32, #tpu.memory_space<vmem>>, vector<8x5xf32>
    %3 = arith.truncf %2 : vector<8x5xf32> to vector<8x5xbf16>
    %c0_3 = arith.constant 0 : index
    %c0_4 = arith.constant 0 : index
    %4 = vector.load %arg3[%c0_3, %c0_4] : memref<19x32xbf16, #tpu.memory_space<vmem>>, vector<19x32xbf16>
    %cst = arith.constant dense<0.000000e+00> : vector<8x32xf32>
    %5 = tpu.matmul %1, %4, %cst {dimension_numbers = #tpu.dot_dimension_numbers<[1], [0], [0], [1], [0, 0, 1, 1], [], []>} : vector<8x19xbf16>, vector<19x32xbf16>, vector<8x32xf32> -> vector<8x32xf32>
    %c0_5 = arith.constant 0 : index
    %c0_6 = arith.constant 0 : index
    %6 = vector.load %arg4[%c0_5, %c0_6] : memref<5x32xbf16, #tpu.memory_space<vmem>>, vector<5x32xbf16>
    %cst_7 = arith.constant dense<0.000000e+00> : vector<8x32xf32>
    %7 = tpu.matmul %3, %6, %cst_7 {dimension_numbers = #tpu.dot_dimension_numbers<[1], [0], [0], [1], [0, 0, 1, 1], [], []>} : vector<8x5xbf16>, vector<5x32xbf16>, vector<8x32xf32> -> vector<8x32xf32>
    %8 = arith.addf %5, %7 : vector<8x32xf32>
    %c0_8 = arith.constant 0 : index
    %c0_9 = arith.constant 0 : index
    %9 = vector.load %arg5[%c0_8, %c0_9] : memref<1x32xf32, #tpu.memory_space<vmem>>, vector<1x32xf32>
    %10 = vector.broadcast %9 : vector<1x32xf32> to vector<8x32xf32>
    %11 = arith.addf %8, %10 : vector<8x32xf32>
    %cst_10 = arith.constant 0.000000e+00 : f32
    %12 = vector.broadcast %cst_10 : f32 to vector<8x32xf32>
    %13 = arith.maximumf %11, %12 : vector<8x32xf32>
    %14 = arith.truncf %13 : vector<8x32xf32> to vector<8x32xbf16>
    %c0_11 = arith.constant 0 : index
    %c0_12 = arith.constant 0 : index
    %15 = vector.load %arg6[%c0_11, %c0_12] : memref<32x32xbf16, #tpu.memory_space<vmem>>, vector<32x32xbf16>
    %cst_13 = arith.constant dense<0.000000e+00> : vector<8x32xf32>
    %16 = tpu.matmul %14, %15, %cst_13 {dimension_numbers = #tpu.dot_dimension_numbers<[1], [0], [0], [1], [0, 0, 1, 1], [], []>} : vector<8x32xbf16>, vector<32x32xbf16>, vector<8x32xf32> -> vector<8x32xf32>
    %c0_14 = arith.constant 0 : index
    %c0_15 = arith.constant 0 : index
    %17 = vector.load %arg7[%c0_14, %c0_15] : memref<1x32xf32, #tpu.memory_space<vmem>>, vector<1x32xf32>
    %18 = vector.broadcast %17 : vector<1x32xf32> to vector<8x32xf32>
    %19 = arith.addf %16, %18 : vector<8x32xf32>
    %cst_16 = arith.constant 0.000000e+00 : f32
    %20 = vector.broadcast %cst_16 : f32 to vector<8x32xf32>
    %21 = arith.maximumf %19, %20 : vector<8x32xf32>
    %22 = arith.truncf %21 : vector<8x32xf32> to vector<8x32xbf16>
    %c0_17 = arith.constant 0 : index
    %c0_18 = arith.constant 0 : index
    %23 = vector.load %arg8[%c0_17, %c0_18] : memref<1x32xbf16, #tpu.memory_space<vmem>>, vector<1x32xbf16>
    %cst_19 = arith.constant dense<0.000000e+00> : vector<1x8xf32>
    %24 = tpu.matmul %23, %22, %cst_19 {dimension_numbers = #tpu.dot_dimension_numbers<[1], [1], [0], [0], [0, 0, 1, 0], [], []>} : vector<1x32xbf16>, vector<8x32xbf16>, vector<1x8xf32> -> vector<1x8xf32>
    %c0_20 = arith.constant 0 : index
    %25 = memref.load %arg9[%c0_20] : memref<1xf32, #tpu.memory_space<smem>>
    %26 = vector.broadcast %25 : f32 to vector<1x8xf32>
    %27 = arith.addf %24, %26 : vector<1x8xf32>
    %c0_21 = arith.constant 0 : index
    %c0_22 = arith.constant 0 : index
    %28 = vector.load %arg10[%c0_21, %c0_22] : memref<1x8xf32, #tpu.memory_space<vmem>>, vector<1x8xf32>
    tpu.vector_store %arg10[%c0_21, %c0_22], %27 {strides = array<i32>} : memref<1x8xf32, #tpu.memory_space<vmem>>, vector<1x8xf32>,
    return
  }
  func.func @transform_0(%arg0: i32) -> (i32, i32) {
    %c0_i32 = arith.constant 0 : i32
    %c0_i32_0 = arith.constant 0 : i32
    return %arg0, %c0_i32 : i32, i32
  }
  func.func @transform_1(%arg0: i32) -> (i32, i32) {
    %c0_i32 = arith.constant 0 : i32
    %c0_i32_0 = arith.constant 0 : i32
    return %arg0, %c0_i32 : i32, i32
  }
  func.func @transform_2(%arg0: i32) -> (i32, i32) {
    %c0_i32 = arith.constant 0 : i32
    %c0_i32_0 = arith.constant 0 : i32
    %c0_i32_1 = arith.constant 0 : i32
    return %c0_i32, %c0_i32_0 : i32, i32
  }
  func.func @transform_3(%arg0: i32) -> (i32, i32) {
    %c0_i32 = arith.constant 0 : i32
    %c0_i32_0 = arith.constant 0 : i32
    %c0_i32_1 = arith.constant 0 : i32
    return %c0_i32, %c0_i32_0 : i32, i32
  }
  func.func @transform_4(%arg0: i32) -> (i32, i32) {
    %c0_i32 = arith.constant 0 : i32
    %c0_i32_0 = arith.constant 0 : i32
    %c0_i32_1 = arith.constant 0 : i32
    return %c0_i32, %c0_i32_0 : i32, i32
  }
  func.func @transform_5(%arg0: i32) -> (i32, i32) {
    %c0_i32 = arith.constant 0 : i32
    %c0_i32_0 = arith.constant 0 : i32
    %c0_i32_1 = arith.constant 0 : i32
    return %c0_i32, %c0_i32_0 : i32, i32
  }
  func.func @transform_6(%arg0: i32) -> (i32, i32) {
    %c0_i32 = arith.constant 0 : i32
    %c0_i32_0 = arith.constant 0 : i32
    %c0_i32_1 = arith.constant 0 : i32
    return %c0_i32, %c0_i32_0 : i32, i32
  }
  func.func @transform_7(%arg0: i32) -> (i32, i32) {
    %c0_i32 = arith.constant 0 : i32
    %c0_i32_0 = arith.constant 0 : i32
    %c0_i32_1 = arith.constant 0 : i32
    return %c0_i32, %c0_i32_0 : i32, i32
  }
  func.func @transform_8(%arg0: i32) -> i32 {
    %c0_i32 = arith.constant 0 : i32
    %c0_i32_0 = arith.constant 0 : i32
    return %c0_i32 : i32
  }
  func.func @transform_9(%arg0: i32) -> (i32, i32) {
    %c0_i32 = arith.constant 0 : i32
    %c0_i32_0 = arith.constant 0 : i32
    return %c0_i32, %arg0 : i32, i32
  }
}

</mosaic_0001>

<bundles_post_ra>
// kernel: squeeze.1
= control target key start
LH: loop header
LB: loop body
LE: loop exit
PB: predicated region body
PF: predicated region fallthrough
CT: control target
= control target key end

     0   :  { %s77_s0 = inlined_call_operand.vmem [shape: f32[6], index: 0, kind: input, shape index: {}]   ;;  %s78_s1 = inlined_call_operand.hbm [shape: f32[2,3,1], index: 1, kind: output, shape index: {}]  }
   0x1   :  { %v6_v0 = vld [vmem:[%s77_s0] sm:$0x1] }
   0x2   :  { %2 = vsyncpa [#allocation1], 0  ;;  %7 = vst [vmem:[#allocation3] sm:$0x1] %v6_v0  ;;  %vm9_vm0 = vcmask 23552   ;;  %s59_s0 = smov 125  }
   0x3   :  { %s60_s8 = smov [#allocation0]  }
   0x4   :  { %s29_s9 = sshll.u32 %s60_s8, 4  ;;  %s30_s9 = int_to_ptr.vmem [resolvable:$true] %s29_s9 }
   0x5   :  { %s37_s10 = scalar_lea.vmem %s30_s9, 32  ;;  %p42_p1 = scmp.lt.s32.totalorder %s30_s9, %s30_s9 }
   0x6   :  { %p38_p0 = scmp.ne.s32.totalorder %s30_s9, %s37_s10  ;;  %p43_p2 = scmp.lt.s32.totalorder %s37_s10, %s37_s10 }
   0x8   :  { %p44_p3 = por %p43_p2, %p42_p1 }
   0x9   :  { %v11_v1 = vld [vmem:[#allocation3] sm:$0x1]  }
   0xa   :  { %v8_v2 = vld [vmem:[#allocation3] sm:$0x1]   ;;  %12 = vrot.lane.b32.xlu0 %v11_v1, %s59_s0  ;;  %p45_p4 = pnand %p44_p3, %p38_p0 }
   0xb   :  { %10 = vst.msk [vmem:[#allocation2] sm:$0x1] %vm9_vm0, %v8_v2  }
  0x7c   :  { %v13_v3 = vpop.permute.xlu0 %12  }
  0x7d   :  { %16 = vst.msk [vmem:[#allocation2 + $0x1] sm:$0x1] %vm9_vm0, %v13_v3  }
  0x84   :  { %v21_v4 = vld [vmem:[#allocation2] sm:$0x3] }
  0x85   :  { %24 = vst [vmem:[#allocation0] sm:$0x3] %v21_v4 }
  0x86   :  { %48 = shalt.err (!%p45_p4)
}
  0x87   :  { %32 = dma.vmem_to_hbm [thread:$0]  %s30_s9, 32, %s78_s1, [#allocation1]  }
  0x88   :  { %57 = dma.done.wait [#allocation1], 32  }
  0x89   :  { %58 = vsyncadd [#allocation1], 4294967264 }
  0x8a   :  { %34 = vsyncpa [#allocation1], 1 }

// kernel: itd3_critic_forward.1
= control target key start
LH: loop header
LB: loop body
LE: loop exit
PB: predicated region body
PF: predicated region fallthrough
CT: control target
= control target key end

     0   :  { %vm46_vm0 = vcmask 1041408   ;;  %vm47_vm1 = vcmask 1042432   ;;  %v341_v0 = vmov 0.0   ;;  %v342_v2 = vmov 65535   ;;  %s437_s3 = inlined_call_operand.vmem [shape: bf16[5,32], index: 3, kind: input, shape index: {}]   ;;  %s438_s2 = inlined_call_operand.vmem [shape: bf16[19,32], index: 2, kind: input, shape index: {}]   ;;  %s439_s1 = inlined_call_operand.vmem [shape: f32[6,5], index: 1, kind: input, shape index: {}]   ;;  %s440_s0 = inlined_call_operand.vmem [shape: f32[6,19], index: 0, kind: input, shape index: {}]   ;;  %s441_s5 = inlined_call_operand.vmem [shape: bf16[32,32], index: 5, kind: input, shape index: {}]   ;;  %s442_s4 = inlined_call_operand.vmem [shape: f32[1,32], index: 4, kind: input, shape index: {}]   ;;  %s443_s6 = inlined_call_operand.vmem [shape: f32[1,32], index: 6, kind: input, shape index: {}]   ;;  %s444_s7 = inlined_call_operand.vmem [shape: bf16[1,32], index: 7, kind: input, shape index: {}]   ;;  %s445_s8 = inlined_call_operand.<no memory space> [shape: f32[1], index: 8, kind: input, shape index: {}]   ;;  %s446_s9 = inlined_call_operand.vmem [shape: f32[1,8], index: 9, kind: output, shape index: {}]  }
   0x1   :  { %306 = vmatprep.subr.bf16.mxu0 %v341_v0  ;;  %v41_v1 = vld [vmem:[%s437_s3] sm:$0x7]  ;;  %v48_v3 = vsel %vm46_vm0, 4294967295, %v342_v2  ;;  %312 = vmatprep.subr.bf16.mxu1 %v341_v0  ;;  %vm106_vm2 = vcmask 1040384   ;;  %vm343_vm3 = vmmov 0   ;;  %vm42_vm4 = vcmask 39936  }
   0x2   :  { %v49_v4 = vsel %vm47_vm1, %v48_v3, 0  ;;  %v337_v5 = vld [vmem:[%s438_s2 + $0x8] ss:$0 sps:$4 sm:$0x33]   ;;  %v107_v6 = vsel %vm106_vm2, 4294967295, %v342_v2  ;;  %308 = vmatprep.mubr.msk.bf16.mxu0 %vm343_vm3, %v341_v0  ;;  %v36_v9 = vld [vmem:[%s439_s1] sm:$0xff]  ;;  %316 = vmatprep.mubr.msk.bf16.mxu1 %vm343_vm3, %v341_v0  ;;  %v233_v40 = vstv %s445_s8 }
   0x3   :  { %v51_v7 = vand.u32 %v49_v4, %v41_v1  ;;  %v108_v8 = vsel %vm46_vm0, %v107_v6, 0  ;;  %v37_v11 = vpack.c.bf16 %v36_v9, %v36_v9  ;;  %v338_v12 = vld [vmem:[%s438_s2] sm:$0xff]   ;;  %vm102_vm5 = vcmask 154624   ;;  %v339_v15 = vld [vmem:[%s441_s5 + $0x8] sm:$0xff]  }
   0x4   :  { %v110_v10 = vand.u32 %v337_v5, %v108_v8  ;;  %v34_v13 = vld [vmem:[%s440_s0] sm:$0xff]  ;;  %vm185_vm6 = vcmask 261120   ;;  %vm280_vm7 = vcmask 57344  }
   0x5   :  { %307 = vmatpush3.bf16.msra.mxu0 %v51_v7  ;;  %v35_v14 = vpack.c.bf16 %v34_v13, %v34_v13  ;;  %v340_v16 = vld [vmem:[%s441_s5] sm:$0xff]  }
   0x6   :  { %313 = vmatpush3.bf16.msra.mxu1 %v110_v10  ;;  %320 = vmatprep.subr.bf16.mxu0 %v341_v0  ;;  %v290_v21 = vld [vmem:[%s442_s4] ss:$0 sm:$0xff] }
   0x7   :  { %314 = vmatprep.subr.bf16.mxu1 %v341_v0  ;;  %v291_v30 = vld [vmem:[%s443_s6] ss:$0 sm:$0xff] }
   0x8   :  { %309 = vmatmul.mubr.msk.bf16.vlgmr.msra.gmra.mxu0 %vm42_vm4, %v37_v11  ;;  %v231_v39 = vld [vmem:[%s444_s7] sm:$0x1] }
   0x9   :  { %324 = vmatprep.mubr.msk.bf16.mxu0 %vm343_vm3, %v341_v0  ;;  %321 = vmatpush3.bf16.msra.mxu0 %v339_v15 }
   0xa   :  { %315 = vmatpush3.bf16.msra.mxu1 %v338_v12  ;;  %322 = vmatprep.subr.bf16.mxu0 %v341_v0 }
   0xb   :  { %328 = vmatprep.subr.bf16.mxu1 %v341_v0 }
   0xd   :  { %317 = vmatmul.mubr.msk.bf16.vlgmr.msra.gmra.mxu1 %vm102_vm5, %v35_v14  ;;  %323 = vmatpush3.bf16.msra.mxu0 %v340_v16 }
   0xe   :  { %330 = vmatprep.mubr.msk.bf16.mxu1 %vm343_vm3, %v341_v0 }
  0xc8   :  { %v87_v17 = vpop.f32.mrf.mxu0 }
  0xca   :  { %v310_v18 = vpop.f32.mrf.mxu0 }
  0xcc   :  { %v90_v19 = vpop.f32.mrf.mxu0 }
  0xcd   :  { %v146_v20 = vpop.f32.mrf.mxu1 }
  0xce   :  { %v147_v22 = vadd.f32 %v146_v20, %v87_v17  ;;  %v311_v23 = vpop.f32.mrf.mxu0 }
  0xcf   :  { %v318_v24 = vpop.f32.mrf.mxu1 }
  0xd0   :  { %v159_v25 = vadd.f32 %v290_v21, %v147_v22 }
  0xd1   :  { %v149_v26 = vpop.f32.mrf.mxu1 }
  0xd2   :  { %v160_v27 = vmax.f32 %v159_v25, 0.0 }
  0xd3   :  { %v319_v28 = vpop.f32.mrf.mxu1 }
  0xd4   :  { %v161_v29 = vpack.c.bf16 %v160_v27, %v160_v27 }
  0xd6   :  { %325 = vmatmul.mubr.msk.bf16.vlgmr.msra.gmra.mxu0 %vm185_vm6, %v161_v29 }
 0x196   :  { %v223_v31 = vpop.f32.mrf.mxu0 }
 0x197   :  { %v224_v32 = vadd.f32 %v291_v30, %v223_v31 }
 0x198   :  { %v326_v33 = vpop.f32.mrf.mxu0 }
 0x199   :  { %v229_v34 = vmax.f32 %v224_v32, 0.0 }
 0x19a   :  { %v226_v35 = vpop.f32.mrf.mxu0 }
 0x19b   :  { %v230_v36 = vpack.c.bf16 %v229_v34, %v229_v34 }
 0x19c   :  { %v327_v37 = vpop.f32.mrf.mxu0 }
 0x19d   :  { %v238_v38 = vsel %vm185_vm6, %v230_v36, 0 }
 0x19e   :  { %329 = vmatpush3.bf16.xpose.msra.mxu1 %v238_v38 }
 0x1a5   :  { %331 = vmatmul.mubr.msk.bf16.vlgmr.msra.gmra.mxu1 %vm185_vm6, %v231_v39 }
 0x265   :  { %v274_v41 = vpop.f32.mrf.mxu1 }
 0x266   :  { %v275_v42 = vadd.f32 %v274_v41, %v233_v40 }
 0x267   :  { %v332_v43 = vpop.f32.mrf.mxu1 }
 0x268   :  { %281 = vst.msk [vmem:[%s446_s9] sm:$0x1] %vm280_vm7, %v275_v42 }
 0x269   :  { %v277_v44 = vpop.f32.mrf.mxu1 }
 0x26b   :  { %v333_v45 = vpop.f32.mrf.mxu1 }

</bundles_post_ra>
